<compile_context>
chip_gen: v7x
topology: tpu7x:2x2x1
jax: 0.10.0
libtpu: 0.0.40
codegen_flags: <defaults>
</compile_context>

<pallas_src>
import numpy as np
import jax
import jax.numpy as jnp
from jax.experimental import pallas as pl
from jax.experimental.pallas import tpu as pltpu


# ------------------------------------------------------------- Pallas kernel

def gfp_kernel(x_ref, w_ref, out_ref):
    x = x_ref[...]            # (B, 1)  f32, batch on sublanes
    w = w_ref[...]            # (1, H)  f32, features on lanes
    # Same op order as the PyTorch module: ((x * W) * 2) * pi  (bit-matching
    # the reference's f32 rounding for the sin/cos arguments).
    proj = (x * w) * 2.0 * np.pi                    # (B, H) broadcast on VPU
    # Single full-width (B, 2H) store -> unmasked lane-dense vst.
    out_ref[...] = jnp.concatenate([jnp.sin(proj), jnp.cos(proj)], axis=-1)


def gaussian_fourier_projection(x, W):
    """x: (B,) time steps; W: (embed_dim//2,) fixed Gaussian weights.

    Returns (B, embed_dim) = concat([sin(x*W*2pi), cos(x*W*2pi)], axis=-1).
    """
    B = x.shape[0]
    H = W.shape[0]
    x2 = x.reshape(B, 1).astype(jnp.float32)    # batch -> sublanes
    w2 = W.reshape(1, H).astype(jnp.float32)    # features -> lanes
    return pl.pallas_call(
        gfp_kernel,
        out_shape=jax.ShapeDtypeStruct((B, 2 * H), jnp.float32),
        in_specs=[
            pl.BlockSpec(memory_space=pltpu.MemorySpace.VMEM),
            pl.BlockSpec(memory_space=pltpu.MemorySpace.VMEM),
        ],
        out_specs=pl.BlockSpec(memory_space=pltpu.MemorySpace.VMEM),
    )(x2, w2)


# ---------------------------------------------------------------- reference

def gfp_ref(x, W):
    x_proj = x[:, None] * W[None, :] * 2 * np.pi
    return jnp.concatenate([jnp.sin(x_proj), jnp.cos(x_proj)], axis=-1)


# --------------------------------------------------------------------- main

if __name__ == "__main__":
    # GaussianFourierProjection(embed_dim=128, scale=30.0) applied to a batch
    # of 8 scalar time steps.  embed_dim=128 keeps the output exactly one
    # vreg wide (lane-dense stores).
    B, EMBED_DIM, SCALE = 8, 128, 30.0

    key = jax.random.PRNGKey(0)
    k_w, k_x = jax.random.split(key)

    # W ~ randn(embed_dim // 2) * scale  (non-trainable buffer in the module)
    W = jax.random.normal(k_w, (EMBED_DIM // 2,), dtype=jnp.float32) * SCALE
    # x: time steps in [0, 1) as used by score-based models.
    x = jax.random.uniform(k_x, (B,), dtype=jnp.float32)

    out = jax.jit(gaussian_fourier_projection)(x, W)
    out = jax.block_until_ready(out)

    ref = gfp_ref(x, W)
    assert out.shape == (B, EMBED_DIM), out.shape
    # Arguments to sin/cos can be O(600) rad (scale=30 * 2pi), so allow a
    # small f32 range-reduction tolerance between the Pallas and XLA lowerings.
    assert np.allclose(np.asarray(out), np.asarray(ref), rtol=1e-4, atol=1e-4), (
        float(np.max(np.abs(np.asarray(out) - np.asarray(ref)))))

    print("KERNEL_OK")
</pallas_src>

<mosaic_0001>
module attributes {stable_mosaic.version = 11 : i64} {
  func.func @gfp_kernel(%arg0: memref<8x1xf32, #tpu.memory_space<vmem>>, %arg1: memref<1x64xf32, #tpu.memory_space<vmem>>, %arg2: memref<8x128xf32, #tpu.memory_space<vmem>>) attributes {dimension_semantics = [], scalar_prefetch = 0 : i64, scratch_operands = 0 : i64, tpu.core_type = #tpu.core_type<tc>} {
    %c0 = arith.constant 0 : index
    %c0_0 = arith.constant 0 : index
    %0 = vector.load %arg0[%c0, %c0_0] : memref<8x1xf32, #tpu.memory_space<vmem>>, vector<8x1xf32>
    %c0_1 = arith.constant 0 : index
    %c0_2 = arith.constant 0 : index
    %1 = vector.load %arg1[%c0_1, %c0_2] : memref<1x64xf32, #tpu.memory_space<vmem>>, vector<1x64xf32>
    %2 = vector.broadcast %0 : vector<8x1xf32> to vector<8x64xf32>
    %3 = vector.broadcast %1 : vector<1x64xf32> to vector<8x64xf32>
    %4 = arith.mulf %2, %3 : vector<8x64xf32>
    %cst = arith.constant 2.000000e+00 : f32
    %5 = vector.broadcast %cst : f32 to vector<8x64xf32>
    %6 = arith.mulf %4, %5 : vector<8x64xf32>
    %cst_3 = arith.constant 3.14159274 : f32
    %7 = vector.broadcast %cst_3 : f32 to vector<8x64xf32>
    %8 = arith.mulf %6, %7 : vector<8x64xf32>
    %9 = math.sin %8 : vector<8x64xf32>
    %10 = math.cos %8 : vector<8x64xf32>
    %11 = tpu.concatenate %9, %10 in 1 : vector<8x64xf32>, vector<8x64xf32> -> vector<8x128xf32>
    %c0_4 = arith.constant 0 : index
    %c0_5 = arith.constant 0 : index
    %12 = vector.load %arg2[%c0_4, %c0_5] : memref<8x128xf32, #tpu.memory_space<vmem>>, vector<8x128xf32>
    tpu.vector_store %arg2[%c0_4, %c0_5], %11 {strides = array<i32>} : memref<8x128xf32, #tpu.memory_space<vmem>>, vector<8x128xf32>,
    return
  }
}

</mosaic_0001>

<bundles_post_ra>
// kernel: gaussian_fourier_projection.1
= control target key start
LH: loop header
LB: loop body
LE: loop exit
PB: predicated region body
PF: predicated region fallthrough
CT: control target
= control target key end

     0   :  { %v307_v1 = vmov 0   ;;  %s370_s0 = inlined_call_operand.vmem [shape: f32[8,1], index: 0, kind: input, shape index: {}]   ;;  %s371_s1 = inlined_call_operand.vmem [shape: f32[1,64], index: 1, kind: input, shape index: {}]   ;;  %s372_s2 = inlined_call_operand.hbm [shape: f32[8,128], index: 2, kind: output, shape index: {}]  }
   0x1   :  { %v12_v0 = vld [vmem:[%s370_s0] sm:$0xff]  ;;  %278 = vset.pattern.permute.xlu0 %v307_v1 }
   0x2   :  { %7 = vsyncpa [#allocation3], 0  ;;  %16 = vperm.xlu0 %278, %v12_v0   ;;  %v256_v2 = vld [vmem:[%s371_s1] ss:$0 sm:$0xff]  ;;  %v308_v18 = vmov 2102212464  }
   0x3   :  { %v309_v20 = vmov 920167782   ;;  %v310_v24 = vmov 1326507024   ;;  %v311_v26 = vmov 683565275  }
   0x4   :  { %v312_v28 = vmov 2475754826   ;;  %v313_v31 = vmov 2131351028   ;;  %s314_s0 = smov 64   ;;  %s315_s1 = smov [#allocation2]  }
   0x5   :  { %s248_s13 = sshll.u32 %s315_s1, 4  ;;  %s249_s13 = int_to_ptr.vmem [resolvable:$true] %s248_s13 }
   0x6   :  { %s283_s14 = scalar_lea.vmem %s249_s13, 128  ;;  %p288_p1 = scmp.lt.s32.totalorder %s249_s13, %s249_s13 }
   0x7   :  { %p284_p0 = scmp.ne.s32.totalorder %s249_s13, %s283_s14  ;;  %p289_p2 = scmp.lt.s32.totalorder %s283_s14, %s283_s14 }
   0x9   :  { %p290_p3 = por %p289_p2, %p288_p1 }
   0xb   :  { %p291_p4 = pnand %p290_p3, %p284_p0 }
  0x81   :  { %v17_v3 = vpop.permute.xlu0 %16 }
  0x82   :  { %v25_v4 = vmul.f32 %v256_v2, %v17_v3 }
  0x84   :  { %v26_v5 = vmul.f32 2.0, %v25_v4 }
  0x86   :  { %v337_v6 = vmul.f32 3.1415927, %v26_v5 }
  0x88   :  { %v31_v7 = vand.u32 2139095040, %v337_v6  ;;  %v28_v8 = vand.u32 2147483647, %v337_v6  ;;  %vm30_vm7 = vcmp.lt.s32.totalorder %v337_v6, 0  ;;  %vm120_vm15 = vweird.f32 %v337_v6 }
  0x8a   :  { %v32_v9 = vshrl.u32 %v31_v7, 23  ;;  %v35_v11 = vand.u32 8388607, %v28_v8  ;;  %vm29_vm8 = vcmp.le.f32.partialorder %v28_v8, 0.7853982 }
  0x8c   :  { %v257_v10 = vadd.s32 4294967169, %v32_v9  ;;  %v36_v14 = vor.u32 8388608, %v35_v11 }
  0x8e   :  { %v38_v12 = vadd.s32 1, %v257_v10  ;;  %v76_v22 = vshll.u32 %v36_v14, 8 }
  0x90   :  { %vm39_vm0 = vcmp.gt.s32.totalorder %v38_v12, 0 }
  0x91   :  { %v40_v13 = vsel %vm39_vm0, %v38_v12, 0  ;;  %vm239_vm0 = vcmask 523264  }
  0x92   :  { %v42_v15 = vand.u32 31, %v40_v13  ;;  %v41_v16 = vshrl.u32 %v40_v13, 5 }
  0x94   :  { %v43_v17 = vsub.s32 32, %v42_v15  ;;  %v54_v19 = vshll.u32 %v308_v18, %v42_v15  ;;  %v57_v21 = vshll.u32 %v309_v20, %v42_v15  ;;  %v45_v27 = vshll.u32 %v311_v26, %v42_v15 }
  0x95   :  { %v48_v30 = vshll.u32 %v312_v28, %v42_v15  ;;  %v51_v33 = vshll.u32 %v313_v31, %v42_v15  ;;  %vm63_vm1 = vcmp.lt.s32.totalorder %v41_v16, 4  ;;  %vm60_vm2 = vcmp.lt.s32.totalorder %v41_v16, 1 }
  0x96   :  { %v55_v23 = vshrl.u32 %v309_v20, %v43_v17  ;;  %v58_v25 = vshrl.u32 %v310_v24, %v43_v17  ;;  %v46_v29 = vshrl.u32 %v312_v28, %v43_v17  ;;  %v49_v32 = vshrl.u32 %v313_v31, %v43_v17 }
  0x97   :  { %v52_v34 = vshrl.u32 %v308_v18, %v43_v17  ;;  %v44_v38 = vshrl.u32 %v311_v26, %v43_v17  ;;  %vm61_vm3 = vcmp.lt.s32.totalorder %v41_v16, 2  ;;  %vm62_vm4 = vcmp.lt.s32.totalorder %v41_v16, 3 }
  0x98   :  { %v56_v35 = vor.u32 %v55_v23, %v54_v19  ;;  %v59_v36 = vor.u32 %v58_v25, %v57_v21  ;;  %v47_v37 = vor.u32 %v46_v29, %v45_v27  ;;  %v50_v39 = vor.u32 %v49_v32, %v48_v30 }
  0x99   :  { %v53_v40 = vor.u32 %v52_v34, %v51_v33 }
  0x9a   :  { %v69_v41 = vsel %vm63_vm1, %v56_v35, 920167782  ;;  %v73_v42 = vsel %vm63_vm1, %v59_v36, 1326507024  ;;  %v68_v44 = vsel %vm60_vm2, %v47_v37, %v50_v39  ;;  %v64_v47 = vsel %vm60_vm2, %v44_v38, %v47_v37 }
  0x9b   :  { %v65_v43 = vsel %vm63_vm1, %v53_v40, 2102212464  ;;  %v70_v45 = vsel %vm62_vm4, %v53_v40, %v69_v41  ;;  %v72_v46 = vsel %vm60_vm2, %v50_v39, %v53_v40  ;;  %v74_v50 = vsel %vm62_vm4, %v56_v35, %v73_v42 }
  0x9c   :  { %v66_v48 = vsel %vm62_vm4, %v50_v39, %v65_v43  ;;  %v71_v49 = vsel %vm61_vm3, %v68_v44, %v70_v45  ;;  %v75_v51 = vsel %vm61_vm3, %v72_v46, %v74_v50 }
  0x9d   :  { %v343_v52 = vmul.u32.u64.low %v76_v22, %v71_v49  ;;  %v344_v53 = vmul.u32.u64.high %v76_v22, %v71_v49, %v343_v52  ;;  %v346_v54 = vmul.u32.u64.low %v76_v22, %v75_v51  ;;  %v347_v55 = vmul.u32.u64.high %v76_v22, %v75_v51, %v346_v54 }
  0x9e   :  { %v67_v56 = vsel %vm61_vm3, %v64_v47, %v66_v48 }
  0x9f   :  { %v86_v57 = vadd.s32 1, %v344_v53  ;;  %v83_v58 = vmul.u32 %v76_v22, %v67_v56  ;;  %vm85_vm5 = vc.u32 %v347_v55, %v343_v52  ;;  %v84_v7 = vadd.s32 %v343_v52, %v347_v55 }
  0xa1   :  { %v87_v59 = vsel %vm85_vm5, %v86_v57, %v344_v53 }
  0xa2   :  { %v88_v60 = vadd.s32 %v87_v59, %v83_v58 }
  0xa4   :  { %v89_v61 = vadd.s32 536870912, %v88_v60 }
  0xa6   :  { %v90_v62 = vshrl.u32 %v89_v61, 30 }
  0xa8   :  { %v91_v63 = vshll.u32 %v90_v62, 30  ;;  %v114_v20 = vsub.s32 4, %v90_v62 }
  0xaa   :  { %v92_v0 = vsub.s32 %v88_v60, %v91_v63  ;;  %v115_v23 = vsel %vm30_vm7, %v114_v20, %v90_v62 }
  0xab   :  { %v117_v25 = vsel %vm29_vm8, 0, %v115_v23 }
  0xac   :  { %v94_v1 = vsub.s32 0, %v92_v0  ;;  %v121_v26 = vadd.s32 3, %v117_v25  ;;  %v225_v28 = vand.u32 3, %v117_v25 }
  0xae   :  { %v258_v2 = vmin.u32 %v94_v1, %v92_v0  ;;  %v122_v27 = vand.u32 3, %v121_v26  ;;  %vm230_vm10 = vcmp.eq.s32.totalorder %v225_v28, 2  ;;  %vm227_vm12 = vcmp.eq.s32.totalorder %v225_v28, 0 }
  0xaf   :  { %vm226_vm14 = vcmp.lt.s32.totalorder %v225_v28, 2 }
  0xb0   :  { %v96_v3 = vclz %v258_v2  ;;  %vm127_vm9 = vcmp.eq.s32.totalorder %v122_v27, 2  ;;  %vm124_vm11 = vcmp.eq.s32.totalorder %v122_v27, 0  ;;  %vm123_vm13 = vcmp.lt.s32.totalorder %v122_v27, 2 }
  0xb2   :  { %v259_v4 = vadd.s32 4294967294, %v96_v3 }
  0xb4   :  { %vm260_vm6 = vcmp.lt.s32.totalorder %v259_v4, 0 }
  0xb5   :  { %v99_v5 = vsel %vm260_vm6, 0, %v259_v4 }
  0xb6   :  { %v100_v9 = vsub.s32 32, %v99_v5  ;;  %v104_v10 = vsub.s32 4294967266, %v99_v5  ;;  %v101_v11 = vshll.u32 %v92_v0, %v99_v5 }
  0xb8   :  { %v102_v12 = vshrl.u32 %v84_v7, %v100_v9  ;;  %v105_v13 = vadd.s32 127, %v104_v10 }
  0xba   :  { %v103_v14 = vor.u32 %v102_v12, %v101_v11  ;;  %v106_v15 = vshll.u32 %v105_v13, 23 }
  0xbc   :  { %v107_v16 = vor.u32 4788187, %v106_v15  ;;  %v110_v18 = vcvt.s32.f32 %v103_v14 }
  0xbe   :  { %v108_v17 = vand.u32 2147483647, %v107_v16 }
  0xc0   :  { %v111_v19 = vmul.f32 %v110_v18, %v108_v17 }
  0xc2   :  { %v112_v21 = vxor.u32 2147483648, %v111_v19 }
  0xc4   :  { %v113_v22 = vsel %vm30_vm7, %v112_v21, %v111_v19 }
  0xc5   :  { %v116_v24 = vsel %vm29_vm8, %v337_v6, %v113_v22 }
  0xc6   :  { %279 = vcosq.f32 %v116_v24 }
  0xc7   :  { %281 = vsinq.f32 %v116_v24 }
  0xd0   :  { %v280_v29 = vpop.eup %279 }
  0xd1   :  { %v282_v30 = vpop.eup %281  ;;  %v128_v31 = vxor.u32 2147483648, %v280_v29 }
  0xd2   :  { %v125_v32 = vxor.u32 2147483648, %v282_v30 }
  0xd3   :  { %v232_v33 = vsel %vm230_vm10, %v128_v31, %v282_v30  ;;  %v129_v8 = vsel %vm127_vm9, %v128_v31, %v282_v30 }
  0xd4   :  { %v229_v34 = vsel %vm227_vm12, %v280_v29, %v125_v32  ;;  %v126_v35 = vsel %vm124_vm11, %v280_v29, %v125_v32 }
  0xd5   :  { %v233_v36 = vsel %vm226_vm14, %v229_v34, %v232_v33  ;;  %v130_v37 = vsel %vm123_vm13, %v126_v35, %v129_v8 }
  0xd6   :  { %v234_v38 = vsel %vm120_vm15, nan, %v233_v36  ;;  %v131_v39 = vsel %vm120_vm15, nan, %v130_v37 }
  0xd7   :  { %236 = vrot.lane.b32.xlu0 %v234_v38, %s314_s0 }
 0x149   :  { %v237_v40 = vpop.permute.xlu0 %236 }
 0x14a   :  { %v240_v41 = vsel %vm239_vm0, %v131_v39, %v237_v40 }
 0x14b   :  { %241 = vst [vmem:[#allocation2] sm:$0xff] %v240_v41 }
 0x14c   :  { %294 = shalt.err (!%p291_p4)
}
 0x14d   :  { %s295_s17 = scalar_lea.hbm %s372_s2, 128 }
 0x14e   :  { %p296_p5 = scmp.ne.s32.totalorder %s372_s2, %s295_s17  ;;  %p299_p6 = scmp.lt.u32.totalorder %s295_s17, %s372_s2 }
 0x150   :  { %p301_p7 = pnand %p299_p6, %p296_p5 }
 0x152   :  { %304 = shalt.err (!%p301_p7)
}
 0x153   :  { %251 = dma.vmem_to_hbm [thread:$0]  %s249_s13, 128, %s372_s2, [#allocation3]  }
 0x154   :  { %305 = dma.done.wait [#allocation3], 128  }
 0x155   :  { %306 = vsyncadd [#allocation3], 4294967168 }
 0x156   :  { %255 = vsyncpa [#allocation3], 1 }

</bundles_post_ra>
